<compile_context>
chip_gen: v7x
topology: tpu7x:2x2x1
jax: 0.10.0
libtpu: 0.0.40
codegen_flags: <defaults>
</compile_context>

<pallas_src>
import functools

import jax
import jax.numpy as jnp
from jax.experimental import pallas as pl
from jax.experimental.pallas import tpu as pltpu

NUM_CLASSES = 10

# lowbias32-style integer mixing constants.
_GOLD = 0x9E3779B9
_MIX1 = 0x7FEB352D
_MIX2 = 0x846CA68B
_GOLD_I32 = _GOLD - (1 << 32)  # signed-int32 bit pattern of _GOLD


def _randint_kernel(seed_ref, out_ref, *, num_classes: int, block_rows: int):
    shape = out_ref.shape  # (block_rows, 128)
    row = jax.lax.broadcasted_iota(jnp.int32, shape, 0)
    col = jax.lax.broadcasted_iota(jnp.int32, shape, 1)
    # Globally unique counter per output element (distinct across grid blocks).
    flat = (pl.program_id(0) * block_rows + row) * shape[1] + col

    # Mix the SMEM seed in on the scalar path (int32, wrapping multiply),
    # then hash per element with uint32 vector ops (logical shifts).
    seed_mix = seed_ref[0] * jnp.int32(_GOLD_I32)
    x = (flat ^ seed_mix).astype(jnp.uint32)
    x = (x ^ (x >> jnp.uint32(16))) * jnp.uint32(_MIX1)
    x = (x ^ (x >> jnp.uint32(15))) * jnp.uint32(_MIX2)
    x = x ^ (x >> jnp.uint32(16))

    # Integer multiply-high: top 16 bits scaled into [0, num_classes).
    # (Bias is O(num_classes / 2^16) — negligible for a random classifier.)
    bits16 = (x >> jnp.uint32(16)).astype(jnp.int32)  # in [0, 65536)
    out_ref[...] = (bits16 * num_classes) >> 16


def _grid_layout(batch: int):
    """Rows of 128 draws needed, split into (block_rows, grid_n)."""
    rows_needed = max(1, pl.cdiv(batch, 128))
    if rows_needed <= 512:
        block_rows = ((rows_needed + 7) // 8) * 8  # sublane-aligned single block
        grid_n = 1
    else:
        # ~256 KiB int32 per block: comfortably inside v7x's smaller VMEM even
        # double-buffered; bigger blocks buy nothing for a write-only kernel.
        block_rows = 512
        grid_n = pl.cdiv(rows_needed, block_rows)
    return block_rows, grid_n


@functools.partial(jax.jit, static_argnums=(1, 2))
def _forward(seed_arr, batch: int, num_classes: int):
    block_rows, grid_n = _grid_layout(batch)
    rows = block_rows * grid_n
    kwargs = {}
    if grid_n > 1:
        # Large batches: let the grid axis shard across TensorCores (v7x has 2).
        kwargs["compiler_params"] = pltpu.CompilerParams(
            dimension_semantics=("parallel",))
    tile = pl.pallas_call(
        functools.partial(
            _randint_kernel, num_classes=num_classes, block_rows=block_rows),
        out_shape=jax.ShapeDtypeStruct((rows, 128), jnp.int32),
        grid=(grid_n,),
        in_specs=[pl.BlockSpec(memory_space=pltpu.MemorySpace.SMEM)],
        out_specs=pl.BlockSpec((block_rows, 128), lambda i: (i, 0)),
        **kwargs,
    )(seed_arr)
    # Under jit this flatten + static slice fuses with the kernel's consumer.
    return tile.reshape(-1)[:batch]


def random_classifier_forward(x, seed: int = 0, num_classes: int = NUM_CLASSES):
    """Equivalent of random_classifier.forward(x, device).

    Returns int32 class indices in [0, num_classes). (torch.randint defaults
    to int64; int32 is sufficient for class indices and TPU-native.)
    """
    seed_arr = jnp.asarray([seed], dtype=jnp.int32)
    return _forward(seed_arr, int(x.shape[0]), int(num_classes))


def init_params(num_classes: int = NUM_CLASSES):
    """Deterministic init of the module's fc layer (unused in forward)."""
    key = jax.random.PRNGKey(0)
    kw, kb = jax.random.split(key)
    bound = 1.0 / jnp.sqrt(3.0)  # nn.Linear(3, NUM_CLASSES) default init range
    fc_w = jax.random.uniform(kw, (num_classes, 3), jnp.float32, -bound, bound)
    fc_b = jax.random.uniform(kb, (num_classes,), jnp.float32, -bound, bound)
    # TODO(synk): os.mkdir / torch.save side effects in __init__ have no
    # Pallas/JAX equivalent and are intentionally omitted.
    return {"fc_w": fc_w, "fc_b": fc_b}


if __name__ == "__main__":
    params = init_params(NUM_CLASSES)  # constructed but unused, as in PyTorch

    key = jax.random.PRNGKey(0)
    # NCHW input with 3 channels (the module's fc is Linear(3, NUM_CLASSES));
    # only x.shape[0] matters to the forward pass.
    x = jax.random.normal(key, (2, 3, 16, 16), dtype=jnp.float32)

    out = random_classifier_forward(x, seed=0, num_classes=NUM_CLASSES)
    out = jax.block_until_ready(out)

    assert out.shape == (x.shape[0],)
    assert out.dtype == jnp.int32
    assert bool(jnp.all((out >= 0) & (out < NUM_CLASSES)))
    print("KERNEL_OK")
</pallas_src>

<mosaic_0001>
module attributes {stable_mosaic.version = 11 : i64} {
  func.func @_randint_kernel(%arg0: i32, %arg1: memref<1xi32, #tpu.memory_space<smem>>, %arg2: memref<8x128xi32, #tpu.memory_space<vmem>>) attributes {dimension_semantics = [#tpu.dimension_semantics<arbitrary>], iteration_bounds = array<i64: 1>, scalar_prefetch = 0 : i64, scratch_operands = 0 : i64, tpu.core_type = #tpu.core_type<tc>, window_params = [{transform_indices = @transform_0, window_bounds = array<i64: 1>}, {transform_indices = @transform_1, window_bounds = array<i64: 8, 128>}]} {
    %0 = tpu.iota {dimensions = array<i32: 0>} : vector<8x128xi32>
    %1 = tpu.iota {dimensions = array<i32: 1>} : vector<8x128xi32>
    %c8_i32 = arith.constant 8 : i32
    %2 = arith.muli %arg0, %c8_i32 : i32
    %3 = vector.broadcast %2 : i32 to vector<8x128xi32>
    %4 = arith.addi %3, %0 : vector<8x128xi32>
    %c128_i32 = arith.constant 128 : i32
    %5 = vector.broadcast %c128_i32 : i32 to vector<8x128xi32>
    %6 = arith.muli %4, %5 : vector<8x128xi32>
    %7 = arith.addi %6, %1 : vector<8x128xi32>
    %c0 = arith.constant 0 : index
    %8 = memref.load %arg1[%c0] : memref<1xi32, #tpu.memory_space<smem>>
    %c-1640531527_i32 = arith.constant -1640531527 : i32
    %9 = arith.muli %8, %c-1640531527_i32 : i32
    %10 = vector.broadcast %9 : i32 to vector<8x128xi32>
    %11 = arith.xori %7, %10 : vector<8x128xi32>
    %c16_i32 = arith.constant 16 : i32
    %12 = vector.broadcast %c16_i32 : i32 to vector<8x128xi32>
    %13 = arith.shrui %11, %12 : vector<8x128xi32>
    %14 = arith.xori %11, %13 : vector<8x128xi32>
    %c2146121005_i32 = arith.constant 2146121005 : i32
    %15 = vector.broadcast %c2146121005_i32 : i32 to vector<8x128xi32>
    %16 = arith.muli %14, %15 : vector<8x128xi32>
    %c15_i32 = arith.constant 15 : i32
    %17 = vector.broadcast %c15_i32 : i32 to vector<8x128xi32>
    %18 = arith.shrui %16, %17 : vector<8x128xi32>
    %19 = arith.xori %16, %18 : vector<8x128xi32>
    %c-2073254261_i32 = arith.constant -2073254261 : i32
    %20 = vector.broadcast %c-2073254261_i32 : i32 to vector<8x128xi32>
    %21 = arith.muli %19, %20 : vector<8x128xi32>
    %c16_i32_0 = arith.constant 16 : i32
    %22 = vector.broadcast %c16_i32_0 : i32 to vector<8x128xi32>
    %23 = arith.shrui %21, %22 : vector<8x128xi32>
    %24 = arith.xori %21, %23 : vector<8x128xi32>
    %c16_i32_1 = arith.constant 16 : i32
    %25 = vector.broadcast %c16_i32_1 : i32 to vector<8x128xi32>
    %26 = arith.shrui %24, %25 : vector<8x128xi32>
    %c10_i32 = arith.constant 10 : i32
    %27 = vector.broadcast %c10_i32 : i32 to vector<8x128xi32>
    %28 = arith.muli %26, %27 : vector<8x128xi32>
    %c16_i32_2 = arith.constant 16 : i32
    %29 = vector.broadcast %c16_i32_2 : i32 to vector<8x128xi32>
    %30 = arith.shrsi %28, %29 : vector<8x128xi32>
    %c0_3 = arith.constant 0 : index
    %c0_4 = arith.constant 0 : index
    %31 = vector.load %arg2[%c0_3, %c0_4] : memref<8x128xi32, #tpu.memory_space<vmem>>, vector<8x128xi32>
    tpu.vector_store %arg2[%c0_3, %c0_4], %30 {strides = array<i32>} : memref<8x128xi32, #tpu.memory_space<vmem>>, vector<8x128xi32>,
    return
  }
  func.func @transform_0(%arg0: i32) -> i32 {
    %c0_i32 = arith.constant 0 : i32
    %c0_i32_0 = arith.constant 0 : i32
    return %c0_i32 : i32
  }
  func.func @transform_1(%arg0: i32) -> (i32, i32) {
    %c0_i32 = arith.constant 0 : i32
    %c0_i32_0 = arith.constant 0 : i32
    return %arg0, %c0_i32 : i32, i32
  }
}

</mosaic_0001>

<bundles_post_ra>
// kernel: _forward.1
= control target key start
LH: loop header
LB: loop body
LE: loop exit
PB: predicated region body
PF: predicated region fallthrough
CT: control target
= control target key end

     0   :  { %v9_v0 = vlaneseq  ;;  %s54_s0 = inlined_call_operand.<no memory space> [shape: s32[1], index: 0, kind: input, shape index: {}]   ;;  %s55_s1 = inlined_call_operand.vmem [shape: s32[8,128], index: 1, kind: output, shape index: {}]  }
   0x1   :  { %s19_s8 = smul.u32 2654435769, %s54_s0 }
   0x2   :  { %v10_v1 = vshrl.u32 %v9_v0, 7  ;;  %v12_v2 = vand.u32 127, %v9_v0 }
   0x3   :  { %v20_v4 = vstv %s19_s8 }
   0x4   :  { %v16_v3 = vmul.u32 128, %v10_v1 }
   0x6   :  { %v17_v5 = vadd.s32 %v16_v3, %v12_v2 }
   0x8   :  { %v21_v6 = vxor.u32 %v20_v4, %v17_v5 }
   0xa   :  { %v22_v7 = vshrl.u32 %v21_v6, 16 }
   0xc   :  { %v23_v8 = vxor.u32 %v22_v7, %v21_v6 }
   0xe   :  { %v24_v9 = vmul.u32 2146121005, %v23_v8 }
  0x10   :  { %v25_v10 = vshrl.u32 %v24_v9, 15 }
  0x12   :  { %v26_v11 = vxor.u32 %v25_v10, %v24_v9 }
  0x14   :  { %v27_v12 = vmul.u32 2221713035, %v26_v11 }
  0x16   :  { %v28_v13 = vshrl.u32 %v27_v12, 16 }
  0x18   :  { %v29_v14 = vxor.u32 %v28_v13, %v27_v12 }
  0x1a   :  { %v30_v15 = vshrl.u32 %v29_v14, 16 }
  0x1c   :  { %v31_v16 = vmul.u32 10, %v30_v15 }
  0x1e   :  { %v32_v17 = vshra.s32 %v31_v16, 16 }
  0x20   :  { %33 = vst [vmem:[%s55_s1] sm:$0xff] %v32_v17 }

</bundles_post_ra>
